<compile_context>
chip_gen: v7x
topology: tpu7x:2x2x1
jax: 0.10.0
libtpu: 0.0.40
codegen_flags: <defaults>
</compile_context>

<pallas_src>
import functools

import jax
import jax.numpy as jnp
from jax.experimental import pallas as pl
from jax.experimental.pallas import tpu as pltpu


def _round_up(n: int, m: int) -> int:
    return ((n + m - 1) // m) * m


def classifier_kernel(x_ref, w1_ref, b1_ref, w2_ref, b2_ref, out_ref):
    # Hidden layer: bf16 MXU matmul with f32 accumulation, bias + ReLU in f32.
    # x arrives in f32 and is cast on the VPU (free under MXU/DMA slack).
    x = x_ref[...].astype(jnp.bfloat16)
    h = jnp.dot(x, w1_ref[...], preferred_element_type=jnp.float32)
    h = jnp.maximum(h + b1_ref[...], 0.0)

    # Output layer (1/temperature already folded into w2/b2 on the host).
    logits = jnp.dot(h.astype(w2_ref.dtype), w2_ref[...],
                     preferred_element_type=jnp.float32) + b2_ref[...]

    # Numerically-stable softmax with EXACT normalization (rows sum to 1).
    m = jnp.max(logits, axis=-1, keepdims=True)
    e = jnp.exp(logits - m)
    denom = jnp.sum(e, axis=-1, keepdims=True)
    out_ref[...] = (e / denom).astype(out_ref.dtype)


def prepare_classifier_params(w1, b1, w2, b2, temperature=1.0):
    """One-time host-side prep (call once, cache the result).

    Pads the hidden/class axes to lane multiples of 128, folds 1/temperature
    into the output layer (softmax(z/T) == softmax(x @ (W/T) + b/T)), and casts
    the weight matrices to bf16 for the MXU.  Biases stay f32; padded class
    columns get a -1e30 bias so they vanish under softmax.
    """
    in_feats, hidden = w1.shape
    nb_classes = w2.shape[1]
    inv_t = 1.0 / float(temperature)

    H_pad = _round_up(hidden, 128)
    C_pad = _round_up(nb_classes, 128)

    f32 = jnp.float32
    w1_p = jnp.zeros((in_feats, H_pad), f32).at[:, :hidden].set(w1.astype(f32))
    b1_p = jnp.zeros((1, H_pad), f32).at[0, :hidden].set(b1.astype(f32))
    w2_p = jnp.zeros((H_pad, C_pad), f32).at[:hidden, :nb_classes].set(
        w2.astype(f32) * inv_t)
    b2_p = jnp.full((1, C_pad), -1e30, f32).at[0, :nb_classes].set(
        b2.astype(f32) * inv_t)

    return (w1_p.astype(jnp.bfloat16), b1_p, w2_p.astype(jnp.bfloat16), b2_p)


@jax.jit
def _classifier_forward_padded(x, w1_bf, b1_p, w2_bf, b2_p):
    B, in_feats = x.shape
    H_pad = w1_bf.shape[1]
    C_pad = w2_bf.shape[1]

    # Resident bf16 weights + f32 biases (held in VMEM across all grid steps).
    weights_bytes = (in_feats * H_pad + H_pad * C_pad) * 2 + (H_pad + C_pad) * 4
    # Conservative budget so the same config also fits v7x (64 MiB VMEM / TC).
    vmem_budget = 44 << 20

    def tile_bytes(tb):
        # double-buffered f32 x tile + double-buffered f32 out tile
        return 2 * tb * in_feats * 4 + 2 * tb * C_pad * 4

    # Batch tile: 512 rows per step for large batches; for small batches pick a
    # tile that still yields >= 2 grid steps (keeps both v7x TCs busy) when the
    # batch has more than one sublane group.
    TB = 512
    if B <= TB:
        TB = _round_up(max(-(-B // 2), 1), 8) if B > 8 else _round_up(max(B, 1), 8)
    # Shrink the batch tile before the resident weights stop fitting.
    while TB > 8 and weights_bytes + tile_bytes(TB) > vmem_budget:
        TB = max(8, TB // 2)
    # TODO(synk): if weights_bytes alone exceeds the VMEM budget (very large
    # hidden/class dims), stream w2 over a class-axis grid with a two-pass
    # softmax instead of keeping it resident.

    B_pad = _round_up(B, TB)
    num_tiles = B_pad // TB

    x_p = x.astype(jnp.float32)
    if B_pad != B:
        x_p = jnp.zeros((B_pad, in_feats), jnp.float32).at[:B].set(x_p)

    vmem_limit = int(min(max(weights_bytes + tile_bytes(TB) + (4 << 20),
                             16 << 20), 48 << 20))

    cost = pl.CostEstimate(
        flops=2 * B_pad * (in_feats * H_pad + H_pad * C_pad),
        transcendentals=B_pad * C_pad,
        bytes_accessed=(B_pad * in_feats * 4 + w1_bf.size * 2 + w2_bf.size * 2
                        + b1_p.size * 4 + b2_p.size * 4 + B_pad * C_pad * 4),
    )

    return pl.pallas_call(
        classifier_kernel,
        out_shape=jax.ShapeDtypeStruct((B_pad, C_pad), jnp.float32),
        grid_spec=pltpu.PrefetchScalarGridSpec(
            num_scalar_prefetch=0,
            grid=(num_tiles,),
            in_specs=[
                pl.BlockSpec((TB, in_feats), lambda i: (i, 0)),     # x: batch-tiled
                pl.BlockSpec((in_feats, H_pad), lambda i: (0, 0)),  # w1: resident
                pl.BlockSpec((1, H_pad), lambda i: (0, 0)),         # b1: resident
                pl.BlockSpec((H_pad, C_pad), lambda i: (0, 0)),     # w2: resident
                pl.BlockSpec((1, C_pad), lambda i: (0, 0)),         # b2: resident
            ],
            out_specs=pl.BlockSpec((TB, C_pad), lambda i: (i, 0)),
        ),
        compiler_params=pltpu.CompilerParams(
            dimension_semantics=("parallel",),
            vmem_limit_bytes=vmem_limit,
        ),
        cost_estimate=cost,
    )(x_p, w1_bf, b1_p, w2_bf, b2_p)


def classifier_forward(x, prepared_params, nb_classes):
    """x: (B, in_feats) f32. prepared_params: output of prepare_classifier_params."""
    out = _classifier_forward_padded(x, *prepared_params)
    B = x.shape[0]
    if out.shape[0] != B or out.shape[1] != nb_classes:
        # Only materialize a slice when batch/class padding was actually needed.
        out = out[:B, :nb_classes]
    return out


def reference_forward(x, w1, b1, w2, b2, temperature):
    h = jnp.maximum(x @ w1 + b1, 0.0)
    logits = (h @ w2 + b2) / temperature
    return jax.nn.softmax(logits, axis=-1)


if __name__ == "__main__":
    # Small synthetic configuration consistent with Classifier(in_feats,
    # hiddens=[64], nb_classes=128): one hidden Linear+ReLU, then output
    # Linear -> /T -> softmax.
    batch = 8
    in_feats = 32
    hidden = 64
    nb_classes = 128
    temperature = 2.0   # non-trivial T exercises the host-side fold

    key = jax.random.PRNGKey(0)
    kx, kw1, kb1, kw2, kb2 = jax.random.split(key, 5)

    x = jax.random.normal(kx, (batch, in_feats), dtype=jnp.float32)

    # nn.Linear-style init; weights stored already transposed to (in, out).
    s1 = 1.0 / jnp.sqrt(in_feats)
    w1 = jax.random.uniform(kw1, (in_feats, hidden), minval=-s1, maxval=s1, dtype=jnp.float32)
    b1 = jax.random.uniform(kb1, (hidden,), minval=-s1, maxval=s1, dtype=jnp.float32)
    s2 = 1.0 / jnp.sqrt(hidden)
    w2 = jax.random.uniform(kw2, (hidden, nb_classes), minval=-s2, maxval=s2, dtype=jnp.float32)
    b2 = jax.random.uniform(kb2, (nb_classes,), minval=-s2, maxval=s2, dtype=jnp.float32)

    # One-time weight prep (pad + temperature fold + bf16 cast), cached.
    params = prepare_classifier_params(w1, b1, w2, b2, temperature=temperature)
    params = jax.block_until_ready(params)

    out = classifier_forward(x, params, nb_classes)
    out = jax.block_until_ready(out)

    ref = reference_forward(x, w1, b1, w2, b2, temperature)
    assert out.shape == (batch, nb_classes)
    # bf16 MXU operands -> loosened tolerance vs the f32 reference.
    assert jnp.allclose(out, ref, atol=2e-3, rtol=2e-2), "mismatch vs reference"
    # Exact f32 normalization in the epilogue -> rows sum to 1 up to f32 rounding.
    assert jnp.allclose(jnp.sum(out, axis=-1), 1.0, atol=1e-4), "softmax rows must sum to 1"

    print("KERNEL_OK")
</pallas_src>

<mosaic_0001>
module attributes {stable_mosaic.version = 11 : i64} {
  func.func @classifier_kernel(%arg0: i32, %arg1: memref<8x32xf32, #tpu.memory_space<vmem>>, %arg2: memref<32x128xbf16, #tpu.memory_space<vmem>>, %arg3: memref<1x128xf32, #tpu.memory_space<vmem>>, %arg4: memref<128x128xbf16, #tpu.memory_space<vmem>>, %arg5: memref<1x128xf32, #tpu.memory_space<vmem>>, %arg6: memref<8x128xf32, #tpu.memory_space<vmem>>) attributes {dimension_semantics = [#tpu.dimension_semantics<parallel>], iteration_bounds = array<i64: 1>, scalar_prefetch = 0 : i64, scratch_operands = 0 : i64, tpu.core_type = #tpu.core_type<tc>, window_params = [{transform_indices = @transform_0, window_bounds = array<i64: 8, 32>}, {pipeline_mode = #tpu.pipeline_mode<synchronous>, transform_indices = @transform_1, window_bounds = array<i64: 32, 128>}, {pipeline_mode = #tpu.pipeline_mode<synchronous>, transform_indices = @transform_2, window_bounds = array<i64: 1, 128>}, {pipeline_mode = #tpu.pipeline_mode<synchronous>, transform_indices = @transform_3, window_bounds = array<i64: 128, 128>}, {pipeline_mode = #tpu.pipeline_mode<synchronous>, transform_indices = @transform_4, window_bounds = array<i64: 1, 128>}, {transform_indices = @transform_5, window_bounds = array<i64: 8, 128>}]} {
    %c0 = arith.constant 0 : index
    %c0_0 = arith.constant 0 : index
    %0 = vector.load %arg1[%c0, %c0_0] : memref<8x32xf32, #tpu.memory_space<vmem>>, vector<8x32xf32>
    %1 = arith.truncf %0 : vector<8x32xf32> to vector<8x32xbf16>
    %c0_1 = arith.constant 0 : index
    %c0_2 = arith.constant 0 : index
    %2 = vector.load %arg2[%c0_1, %c0_2] : memref<32x128xbf16, #tpu.memory_space<vmem>>, vector<32x128xbf16>
    %cst = arith.constant dense<0.000000e+00> : vector<8x128xf32>
    %3 = tpu.matmul %1, %2, %cst {dimension_numbers = #tpu.dot_dimension_numbers<[1], [0], [0], [1], [0, 0, 1, 1], [], []>} : vector<8x32xbf16>, vector<32x128xbf16>, vector<8x128xf32> -> vector<8x128xf32>
    %c0_3 = arith.constant 0 : index
    %c0_4 = arith.constant 0 : index
    %4 = vector.load %arg3[%c0_3, %c0_4] : memref<1x128xf32, #tpu.memory_space<vmem>>, vector<1x128xf32>
    %5 = vector.broadcast %4 : vector<1x128xf32> to vector<8x128xf32>
    %6 = arith.addf %3, %5 : vector<8x128xf32>
    %cst_5 = arith.constant 0.000000e+00 : f32
    %7 = vector.broadcast %cst_5 : f32 to vector<8x128xf32>
    %8 = arith.maximumf %6, %7 : vector<8x128xf32>
    %9 = arith.truncf %8 : vector<8x128xf32> to vector<8x128xbf16>
    %c0_6 = arith.constant 0 : index
    %c0_7 = arith.constant 0 : index
    %10 = vector.load %arg4[%c0_6, %c0_7] : memref<128x128xbf16, #tpu.memory_space<vmem>>, vector<128x128xbf16>
    %cst_8 = arith.constant dense<0.000000e+00> : vector<8x128xf32>
    %11 = tpu.matmul %9, %10, %cst_8 {dimension_numbers = #tpu.dot_dimension_numbers<[1], [0], [0], [1], [0, 0, 1, 1], [], []>} : vector<8x128xbf16>, vector<128x128xbf16>, vector<8x128xf32> -> vector<8x128xf32>
    %c0_9 = arith.constant 0 : index
    %c0_10 = arith.constant 0 : index
    %12 = vector.load %arg5[%c0_9, %c0_10] : memref<1x128xf32, #tpu.memory_space<vmem>>, vector<1x128xf32>
    %13 = vector.broadcast %12 : vector<1x128xf32> to vector<8x128xf32>
    %14 = arith.addf %11, %13 : vector<8x128xf32>
    %cst_11 = arith.constant dense<0xFF800000> : vector<8xf32>
    %15 = vector.multi_reduction <maximumf>, %14, %cst_11 [1] : vector<8x128xf32> to vector<8xf32>
    %16 = vector.shape_cast %15 : vector<8xf32> to vector<8x1xf32>
    %17 = vector.broadcast %16 : vector<8x1xf32> to vector<8x128xf32>
    %18 = arith.subf %14, %17 : vector<8x128xf32>
    %19 = math.exp %18 : vector<8x128xf32>
    %cst_12 = arith.constant dense<0.000000e+00> : vector<8xf32>
    %20 = vector.multi_reduction <add>, %19, %cst_12 [1] : vector<8x128xf32> to vector<8xf32>
    %21 = vector.shape_cast %20 : vector<8xf32> to vector<8x1xf32>
    %22 = vector.broadcast %21 : vector<8x1xf32> to vector<8x128xf32>
    %23 = arith.divf %19, %22 : vector<8x128xf32>
    %c0_13 = arith.constant 0 : index
    %c0_14 = arith.constant 0 : index
    %24 = vector.load %arg6[%c0_13, %c0_14] : memref<8x128xf32, #tpu.memory_space<vmem>>, vector<8x128xf32>
    tpu.vector_store %arg6[%c0_13, %c0_14], %23 {strides = array<i32>} : memref<8x128xf32, #tpu.memory_space<vmem>>, vector<8x128xf32>,
    return
  }
  func.func @transform_0(%arg0: i32) -> (i32, i32) {
    %c0_i32 = arith.constant 0 : i32
    %c0_i32_0 = arith.constant 0 : i32
    return %arg0, %c0_i32 : i32, i32
  }
  func.func @transform_1(%arg0: i32) -> (i32, i32) {
    %c0_i32 = arith.constant 0 : i32
    %c0_i32_0 = arith.constant 0 : i32
    %c0_i32_1 = arith.constant 0 : i32
    return %c0_i32, %c0_i32_0 : i32, i32
  }
  func.func @transform_2(%arg0: i32) -> (i32, i32) {
    %c0_i32 = arith.constant 0 : i32
    %c0_i32_0 = arith.constant 0 : i32
    %c0_i32_1 = arith.constant 0 : i32
    return %c0_i32, %c0_i32_0 : i32, i32
  }
  func.func @transform_3(%arg0: i32) -> (i32, i32) {
    %c0_i32 = arith.constant 0 : i32
    %c0_i32_0 = arith.constant 0 : i32
    %c0_i32_1 = arith.constant 0 : i32
    return %c0_i32, %c0_i32_0 : i32, i32
  }
  func.func @transform_4(%arg0: i32) -> (i32, i32) {
    %c0_i32 = arith.constant 0 : i32
    %c0_i32_0 = arith.constant 0 : i32
    %c0_i32_1 = arith.constant 0 : i32
    return %c0_i32, %c0_i32_0 : i32, i32
  }
  func.func @transform_5(%arg0: i32) -> (i32, i32) {
    %c0_i32 = arith.constant 0 : i32
    %c0_i32_0 = arith.constant 0 : i32
    return %arg0, %c0_i32 : i32, i32
  }
}

</mosaic_0001>

<bundles_post_ra>
// kernel: _classifier_forward_padded.1
= control target key start
LH: loop header
LB: loop body
LE: loop exit
PB: predicated region body
PF: predicated region fallthrough
CT: control target
= control target key end

     0   :  { %10 = vsyncpa [#allocation3], 0  ;;  %s536_s0 = inlined_call_operand.hbm [shape: f32[8,32], index: 0, kind: input, shape index: {}]   ;;  %s537_s1 = inlined_call_operand.hbm [shape: bf16[32,128], index: 1, kind: input, shape index: {}]   ;;  %s538_s2 = inlined_call_operand.vmem [shape: f32[1,128], index: 2, kind: input, shape index: {}]   ;;  %s539_s3 = inlined_call_operand.hbm [shape: bf16[128,128], index: 3, kind: input, shape index: {}]   ;;  %s540_s4 = inlined_call_operand.vmem [shape: f32[1,128], index: 4, kind: input, shape index: {}]   ;;  %s541_s5 = inlined_call_operand.hbm [shape: f32[8,128], index: 5, kind: output, shape index: {}]  }
   0x1   :  { %11 = vsyncpa [#allocation6], 0 }
   0x2   :  { %12 = vsyncpa [#allocation4], 0  ;;  %s438_s18 = smov [#allocation5]   ;;  %s344_s22 = scalar_lea.hbm %s537_s1, 256 }
   0x3   :  { %s28_s19 = sshll.u32 %s438_s18, 4  ;;  %p345_p0 = scmp.ne.s32.totalorder %s537_s1, %s344_s22  ;;  %s29_s19 = int_to_ptr.vmem [resolvable:$true] %s28_s19 }
   0x4   :  { %p348_p1 = scmp.lt.u32.totalorder %s344_s22, %s537_s1 }
   0x6   :  { %p350_p2 = pnand %p348_p1, %p345_p0 }
   0x8   :  { %353 = shalt.err (!%p350_p2)
}
   0x9   :  { %s354_s27 = scalar_lea.vmem %s29_s19, 256  ;;  %p359_p4 = scmp.lt.s32.totalorder %s29_s19, %s29_s19 }
   0xa   :  { %p355_p3 = scmp.ne.s32.totalorder %s29_s19, %s354_s27  ;;  %p360_p5 = scmp.lt.s32.totalorder %s354_s27, %s354_s27 }
   0xc   :  { %p361_p6 = por %p360_p5, %p359_p4 }
   0xe   :  { %p362_p7 = pnand %p361_p6, %p355_p3 }
  0x10   :  { %365 = shalt.err (!%p362_p7)
}
  0x11   :  { %s439_s28 = smov 64   ;;  %s440_s29 = smov 4  }
  0x12   :  { %34 = dma.hbm_to_vmem [thread:$0]  %s537_s1, 256, %s29_s19, [#allocation6], %s439_s28, %s439_s28, %s440_s29  }
  0x13   :  { %s441_s7 = smov [#allocation2]   ;;  %s442_s9 = smov [#allocation7]  }
  0x14   :  { %s19_s8 = sshll.u32 %s441_s7, 4  ;;  %s42_s10 = sshll.u32 %s442_s9, 4  ;;  %s20_s8 = int_to_ptr.vmem [resolvable:$true] %s19_s8  ;;  %s43_s10 = int_to_ptr.vmem [resolvable:$true] %s42_s10 }
  0x15   :  { %s366_s13 = scalar_lea.hbm %s536_s0, 128 }
  0x16   :  { %p367_p8 = scmp.ne.s32.totalorder %s536_s0, %s366_s13  ;;  %p370_p9 = scmp.lt.u32.totalorder %s366_s13, %s536_s0 }
  0x18   :  { %p372_p10 = pnand %p370_p9, %p367_p8 }
  0x1a   :  { %375 = shalt.err (!%p372_p10)
}
  0x1b   :  { %s376_s1 = scalar_lea.vmem %s20_s8, 128  ;;  %p381_p12 = scmp.lt.s32.totalorder %s20_s8, %s20_s8 }
  0x1c   :  { %p377_p11 = scmp.ne.s32.totalorder %s20_s8, %s376_s1  ;;  %p382_p13 = scmp.lt.s32.totalorder %s376_s1, %s376_s1 }
  0x1e   :  { %p383_p0 = por %p382_p13, %p381_p12 }
  0x20   :  { %p384_p1 = pnand %p383_p0, %p377_p11 }
  0x22   :  { %387 = shalt.err (!%p384_p1)
}
  0x23   :  { %22 = dma.hbm_to_vmem [thread:$0]  %s536_s0, 128, %s20_s8, [#allocation3]  }
  0x24   :  { %s388_s22 = scalar_lea.hbm %s539_s3, 1024 }
  0x25   :  { %p389_p2 = scmp.ne.s32.totalorder %s539_s3, %s388_s22  ;;  %p392_p3 = scmp.lt.u32.totalorder %s388_s22, %s539_s3 }
  0x27   :  { %p394_p4 = pnand %p392_p3, %p389_p2 }
  0x29   :  { %397 = shalt.err (!%p394_p4)
}
  0x2a   :  { %s398_s27 = scalar_lea.vmem %s43_s10, 1024  ;;  %p403_p6 = scmp.lt.s32.totalorder %s43_s10, %s43_s10 }
  0x2b   :  { %p399_p5 = scmp.ne.s32.totalorder %s43_s10, %s398_s27  ;;  %p404_p7 = scmp.lt.s32.totalorder %s398_s27, %s398_s27 }
  0x2d   :  { %p405_p8 = por %p404_p7, %p403_p6 }
  0x2f   :  { %p406_p9 = pnand %p405_p8, %p399_p5 }
  0x31   :  { %409 = shalt.err (!%p406_p9)
}
  0x32   :  { %48 = dma.hbm_to_vmem [thread:$0]  %s539_s3, 1024, %s43_s10, [#allocation6], %s439_s28, %s439_s28, %s440_s29  }
  0x33   :  { %432 = dma.done.wait [#allocation3], 128  }
  0x34   :  { %433 = vsyncadd [#allocation3], 4294967168 }
  0x35   :  { %434 = dma.done.wait [#allocation6], 1280  }
  0x36   :  { %435 = vsyncadd [#allocation6], 4294966016  ;;  %v443_v0 = vmov 0.0   ;;  %vm444_vm0 = vmmov 0   ;;  %v330_v1 = vld [vmem:[#allocation5] sm:$0xff]   ;;  %v331_v2 = vld [vmem:[#allocation5 + $0x8] sm:$0xff]  }
  0x37   :  { %294 = vmatprep.subr.bf16.mxu0 %v443_v0  ;;  %298 = vmatprep.mubr.msk.bf16.mxu0 %vm444_vm0, %v443_v0  ;;  %v61_v3 = vld [vmem:[#allocation2] sm:$0xff]  ;;  %v332_v4 = vld [vmem:[#allocation7] sm:$0xff]   ;;  %vm86_vm1 = vcmask 261120   ;;  %v334_v7 = vld [vmem:[#allocation7 + $0x10] sm:$0xff]  }
  0x38   :  { %302 = vmatprep.subr.bf16.mxu1 %v443_v0  ;;  %318 = vmatprep.mubr.msk.bf16.mxu1 %vm444_vm0, %v443_v0  ;;  %v62_v5 = vpack.c.bf16 %v61_v3, %v61_v3  ;;  %v333_v6 = vld [vmem:[#allocation7 + $0x8] sm:$0xff]   ;;  %v335_v8 = vld [vmem:[#allocation7 + $0x18] sm:$0xff]   ;;  %v336_v9 = vld [vmem:[#allocation7 + $0x20] sm:$0xff]  }
  0x39   :  { %295 = vmatpush3.bf16.msra.mxu0 %v330_v1  ;;  %303 = vmatpush3.bf16.msra.mxu1 %v332_v4  ;;  %v337_v10 = vld [vmem:[#allocation7 + $0x28] sm:$0xff]   ;;  %v338_v11 = vld [vmem:[#allocation7 + $0x30] sm:$0xff]   ;;  %v339_v12 = vld [vmem:[#allocation7 + $0x38] sm:$0xff]  }
  0x3a   :  { %296 = vmatprep.subr.bf16.mxu0 %v443_v0  ;;  %304 = vmatprep.subr.bf16.mxu1 %v443_v0  ;;  %v269_v13 = vld [vmem:[%s538_s2] ss:$0 sm:$0xff]  ;;  %s445_s2 = smov [#allocation8]  }
  0x3b   :  { %v273_v21 = vld [vmem:[%s540_s4] ss:$0 sm:$0xff]  ;;  %s259_s7 = sshll.u32 %s445_s2, 4  ;;  %s260_s7 = int_to_ptr.vmem [resolvable:$true] %s259_s7 }
  0x3c   :  { %s410_s4 = scalar_lea.vmem %s260_s7, 128  ;;  %p415_p11 = scmp.lt.s32.totalorder %s260_s7, %s260_s7 }
  0x3d   :  { %297 = vmatpush3.bf16.msra.mxu0 %v331_v2  ;;  %305 = vmatpush3.bf16.msra.mxu1 %v333_v6  ;;  %p411_p10 = scmp.ne.s32.totalorder %s260_s7, %s410_s4  ;;  %p416_p12 = scmp.lt.s32.totalorder %s410_s4, %s410_s4 }
  0x3e   :  { %306 = vmatprep.subr.bf16.mxu1 %v443_v0 }
  0x3f   :  { %p417_p13 = por %p416_p12, %p415_p11 }
  0x40   :  { %299 = vmatmul.mubr.msk.bf16.vlgmr.msra.gmra.mrb[0].mxu0 %vm86_vm1, %v62_v5 }
  0x41   :  { %307 = vmatpush3.bf16.msra.mxu1 %v334_v7  ;;  %p418_p0 = pnand %p417_p13, %p411_p10 }
  0x42   :  { %308 = vmatprep.subr.bf16.mxu1 %v443_v0 }
  0x45   :  { %309 = vmatpush3.bf16.msra.mxu1 %v335_v8 }
  0x46   :  { %310 = vmatprep.subr.bf16.mxu1 %v443_v0 }
  0x49   :  { %311 = vmatpush3.bf16.msra.mxu1 %v336_v9 }
  0x4a   :  { %312 = vmatprep.subr.bf16.mxu1 %v443_v0 }
  0x4d   :  { %313 = vmatpush3.bf16.msra.mxu1 %v337_v10 }
  0x4e   :  { %314 = vmatprep.subr.bf16.mxu1 %v443_v0 }
  0x51   :  { %315 = vmatpush3.bf16.msra.mxu1 %v338_v11 }
  0x52   :  { %316 = vmatprep.subr.bf16.mxu1 %v443_v0 }
  0x55   :  { %317 = vmatpush3.bf16.msra.mxu1 %v339_v12 }
 0x113   :  { %v124_v14 = vpop.f32.mrb[0].mxu0 }
 0x114   :  { %v125_v15 = vadd.f32 %v269_v13, %v124_v14  ;;  %v300_v16 = vpop.f32.mrb[1].mxu0 }
 0x115   :  { %v127_v17 = vpop.f32.mrb[2].mxu0 }
 0x116   :  { %v130_v18 = vmax.f32 %v125_v15, 0.0  ;;  %v301_v19 = vpop.f32.mrb[3].mxu0 }
 0x118   :  { %v131_v20 = vpack.c.bf16 %v130_v18, %v130_v18 }
 0x11a   :  { %319 = vmatmul.mubr.bf16.vlgmr.msra.gmra.mrb[0].mxu1 %v131_v20 }
 0x1ed   :  { %v237_v22 = vpop.f32.mrb[0].mxu1 }
 0x1ee   :  { %v238_v23 = vadd.f32 %v273_v21, %v237_v22  ;;  %v320_v24 = vpop.f32.mrb[1].mxu1 }
 0x1ef   :  { %v240_v25 = vpop.f32.mrb[2].mxu1 }
 0x1f0   :  { %243 = vmax.xlane.f32.xlu0 %v238_v23  ;;  %v321_v26 = vpop.f32.mrb[3].mxu1 }
 0x27d   :  { %v244_v27 = vpop.xlane.xlu0 %243 }
 0x27e   :  { %v245_v28 = vsub.f32 %v238_v23, %v244_v27 }
 0x280   :  { %v246_v29 = vmul.f32 1.442695, %v245_v28 }
 0x282   :  { %340 = vpow2.f32 %v246_v29 }
 0x28c   :  { %v341_v30 = vpop.eup %340 }
 0x28d   :  { %248 = vadd.xlane.f32.xlu0 %v341_v30 }
 0x31a   :  { %v249_v31 = vpop.xlane.xlu0 %248 }
 0x31b   :  { %342 = vrcp.f32 %v249_v31 }
 0x325   :  { %v343_v32 = vpop.eup %342 }
 0x326   :  { %v251_v33 = vmul.f32 %v343_v32, %v341_v30 }
 0x328   :  { %252 = vst [vmem:[#allocation8] sm:$0xff] %v251_v33 }
 0x329   :  { %421 = shalt.err (!%p418_p0)
}
 0x32a   :  { %s422_s10 = scalar_lea.hbm %s541_s5, 128 }
 0x32b   :  { %p423_p1 = scmp.ne.s32.totalorder %s541_s5, %s422_s10  ;;  %p426_p2 = scmp.lt.u32.totalorder %s422_s10, %s541_s5 }
 0x32d   :  { %p428_p3 = pnand %p426_p2, %p423_p1 }
 0x32f   :  { %431 = shalt.err (!%p428_p3)
}
 0x330   :  { %262 = dma.vmem_to_hbm [thread:$0]  %s260_s7, 128, %s541_s5, [#allocation4]  }
 0x331   :  { %436 = dma.done.wait [#allocation4], 128  }
 0x332   :  { %437 = vsyncadd [#allocation4], 4294967168 }
 0x333   :  { %266 = vsyncpa [#allocation3], 1 }
 0x334   :  { %267 = vsyncpa [#allocation6], 1 }
 0x335   :  { %268 = vsyncpa [#allocation4], 1 }

</bundles_post_ra>
